<compile_context>
chip_gen: v6e
topology: v6e:2x2x1
jax: 0.10.0
libtpu: 0.0.40
codegen_flags: <defaults>
</compile_context>

<pallas_src>
import jax
import jax.numpy as jnp
import numpy as np
from jax.experimental import pallas as pl
from jax.experimental.pallas import tpu as pltpu

# ---- static module configuration (from Net.__init__) -----------------------
EMB_DIMS = [2, 3, 1, 4]          # PermutePooledEmbeddings embs_dims (sum = 10)
PERMUTE = [3, 0, 2, 1]           # segment permutation (output seg i = input seg PERMUTE[i])
HIDDEN = sum(EMB_DIMS)           # 10

LANES = 128                      # vreg lane width (lane-dense last dim)
MAX_BLOCK_ROWS = 2048            # 2048x128 f32 tile = 1 MiB per buffer


def _column_permutation_indices():
    """Output hidden-column k reads input hidden-column perm_idx[k]."""
    offsets = np.concatenate([[0], np.cumsum(EMB_DIMS)])
    idx = []
    for seg in PERMUTE:
        idx.extend(range(offsets[seg], offsets[seg + 1]))
    return np.asarray(idx, dtype=np.int32)


_PERM_IDX = _column_permutation_indices()   # [6,7,8,9, 0,1, 5, 2,3,4]


# ---- Pallas kernel ----------------------------------------------------------
def _net_kernel(w1_ref, w2_ref, x_ref, o_ref):
    # w1_ref: (10, 1) f32 in SMEM (fc1.weight)
    # w2_ref: (1, 10) f32 in SMEM (fc2.weight)
    # x_ref / o_ref: (TM, 128) f32 tiles in VMEM
    #
    # Fold fc1 -> permute_pooled_embs -> fc2 into one scalar on the scalar
    # unit (statically-unrolled 10-term dot; completely hidden behind DMA).
    scale = w1_ref[int(_PERM_IDX[0]), 0] * w2_ref[0, 0]
    for k in range(1, HIDDEN):
        scale = scale + w1_ref[int(_PERM_IDX[k]), 0] * w2_ref[0, k]
    o_ref[...] = x_ref[...] * scale


def net_forward(x, w1, w2):
    """x: (B, 1) f32; w1: (10, 1) f32 (fc1.weight); w2: (1, 10) f32 (fc2.weight)."""
    B = x.shape[0]

    rows = max(1, pl.cdiv(B, LANES))          # slab rows needed to hold B elems
    rows8 = ((rows + 7) // 8) * 8             # sublane aligned

    # Tile rows: big enough to amortize the ~0.35us per-grid-step overhead
    # against the HBM DMA, >= 2 grid steps whenever there is enough data
    # (so both v7x TensorCores are fed), minimal row-padding waste.
    n_tiles = max(2, pl.cdiv(rows8, MAX_BLOCK_ROWS))
    tm = ((pl.cdiv(rows8, n_tiles) + 7) // 8) * 8
    tm = max(8, min(tm, MAX_BLOCK_ROWS, rows8))
    rows_padded = pl.cdiv(rows8, tm) * tm
    padded_n = rows_padded * LANES

    # Lane-dense slab: (B, 1) -> (rows_padded, 128). When B is already
    # aligned this is a layout no-op; otherwise pad+reshape form a single
    # fused producer that XLA may fuse directly into the pallas_call input
    # (allow_input_fusion below).
    x_flat = x.reshape(-1)
    if padded_n != B:
        x_flat = jnp.pad(x_flat, (0, padded_n - B))
    x2d = x_flat.reshape(rows_padded, LANES)

    out2d = pl.pallas_call(
        _net_kernel,
        out_shape=jax.ShapeDtypeStruct((rows_padded, LANES), x.dtype),
        grid=(rows_padded // tm,),
        in_specs=[
            pl.BlockSpec(memory_space=pltpu.MemorySpace.SMEM),   # fc1.weight
            pl.BlockSpec(memory_space=pltpu.MemorySpace.SMEM),   # fc2.weight
            pl.BlockSpec((tm, LANES), lambda i: (i, 0)),         # x tile
        ],
        out_specs=pl.BlockSpec((tm, LANES), lambda i: (i, 0)),
        compiler_params=pltpu.CompilerParams(
            dimension_semantics=("parallel",),        # shard the 1-D grid across TCs
            allow_input_fusion=[False, False, True],  # fuse pad/reshape into x input
        ),
    )(w1, w2, x2d)

    if padded_n != B:
        return out2d.reshape(-1)[:B].reshape(B, 1)
    return out2d.reshape(B, 1)


# ---- reference (pure JAX, mirrors the PyTorch module) -----------------------
def net_reference(x, w1, w2):
    h = x @ w1.T                    # fc1
    hp = h[:, _PERM_IDX]            # permute_pooled_embs
    return hp @ w2.T                # fc2


if __name__ == "__main__":
    key = jax.random.PRNGKey(0)
    k_x, k_w1, k_w2 = jax.random.split(key, 3)

    # Deterministic synthetic parameters (shapes match torch.nn.Linear weights).
    w1 = jax.random.uniform(k_w1, (HIDDEN, 1), dtype=jnp.float32, minval=-1.0, maxval=1.0)  # fc1.weight
    w2 = jax.random.uniform(k_w2, (1, HIDDEN), dtype=jnp.float32, minval=-1.0, maxval=1.0)  # fc2.weight

    # B=300  : ragged / padded path, single-tile grid.
    # B=4096 : aligned no-pad fast path with a 2-step "parallel" grid.
    for B in (300, 4096):
        x = jax.random.normal(jax.random.fold_in(k_x, B), (B, 1), dtype=jnp.float32)
        out = net_forward(x, w1, w2)
        jax.block_until_ready(out)
        ref = net_reference(x, w1, w2)
        np.testing.assert_allclose(np.asarray(out), np.asarray(ref), rtol=1e-5, atol=1e-5)

    print("KERNEL_OK")
</pallas_src>

<mosaic_0001>
module attributes {stable_mosaic.version = 11 : i64} {
  func.func @_net_kernel(%arg0: i32, %arg1: memref<10x1xf32, #tpu.memory_space<smem>>, %arg2: memref<1x10xf32, #tpu.memory_space<smem>>, %arg3: memref<8x128xf32, #tpu.memory_space<vmem>>, %arg4: memref<8x128xf32, #tpu.memory_space<vmem>>) attributes {dimension_semantics = [#tpu.dimension_semantics<parallel>], iteration_bounds = array<i64: 1>, scalar_prefetch = 0 : i64, scratch_operands = 0 : i64, tpu.core_type = #tpu.core_type<tc>, window_params = [{transform_indices = @transform_0, window_bounds = array<i64: 10, 1>}, {transform_indices = @transform_1, window_bounds = array<i64: 1, 10>}, {transform_indices = @transform_2, window_bounds = array<i64: 8, 128>}, {transform_indices = @transform_3, window_bounds = array<i64: 8, 128>}]} {
    %c6 = arith.constant 6 : index
    %c0 = arith.constant 0 : index
    %0 = memref.load %arg1[%c6, %c0] : memref<10x1xf32, #tpu.memory_space<smem>>
    %c0_0 = arith.constant 0 : index
    %c0_1 = arith.constant 0 : index
    %1 = memref.load %arg2[%c0_0, %c0_1] : memref<1x10xf32, #tpu.memory_space<smem>>
    %2 = arith.mulf %0, %1 : f32
    %c7 = arith.constant 7 : index
    %c0_2 = arith.constant 0 : index
    %3 = memref.load %arg1[%c7, %c0_2] : memref<10x1xf32, #tpu.memory_space<smem>>
    %c0_3 = arith.constant 0 : index
    %c1 = arith.constant 1 : index
    %4 = memref.load %arg2[%c0_3, %c1] : memref<1x10xf32, #tpu.memory_space<smem>>
    %5 = arith.mulf %3, %4 : f32
    %6 = arith.addf %2, %5 : f32
    %c8 = arith.constant 8 : index
    %c0_4 = arith.constant 0 : index
    %7 = memref.load %arg1[%c8, %c0_4] : memref<10x1xf32, #tpu.memory_space<smem>>
    %c0_5 = arith.constant 0 : index
    %c2 = arith.constant 2 : index
    %8 = memref.load %arg2[%c0_5, %c2] : memref<1x10xf32, #tpu.memory_space<smem>>
    %9 = arith.mulf %7, %8 : f32
    %10 = arith.addf %6, %9 : f32
    %c9 = arith.constant 9 : index
    %c0_6 = arith.constant 0 : index
    %11 = memref.load %arg1[%c9, %c0_6] : memref<10x1xf32, #tpu.memory_space<smem>>
    %c0_7 = arith.constant 0 : index
    %c3 = arith.constant 3 : index
    %12 = memref.load %arg2[%c0_7, %c3] : memref<1x10xf32, #tpu.memory_space<smem>>
    %13 = arith.mulf %11, %12 : f32
    %14 = arith.addf %10, %13 : f32
    %c0_8 = arith.constant 0 : index
    %c0_9 = arith.constant 0 : index
    %15 = memref.load %arg1[%c0_8, %c0_9] : memref<10x1xf32, #tpu.memory_space<smem>>
    %c0_10 = arith.constant 0 : index
    %c4 = arith.constant 4 : index
    %16 = memref.load %arg2[%c0_10, %c4] : memref<1x10xf32, #tpu.memory_space<smem>>
    %17 = arith.mulf %15, %16 : f32
    %18 = arith.addf %14, %17 : f32
    %c1_11 = arith.constant 1 : index
    %c0_12 = arith.constant 0 : index
    %19 = memref.load %arg1[%c1_11, %c0_12] : memref<10x1xf32, #tpu.memory_space<smem>>
    %c0_13 = arith.constant 0 : index
    %c5 = arith.constant 5 : index
    %20 = memref.load %arg2[%c0_13, %c5] : memref<1x10xf32, #tpu.memory_space<smem>>
    %21 = arith.mulf %19, %20 : f32
    %22 = arith.addf %18, %21 : f32
    %c5_14 = arith.constant 5 : index
    %c0_15 = arith.constant 0 : index
    %23 = memref.load %arg1[%c5_14, %c0_15] : memref<10x1xf32, #tpu.memory_space<smem>>
    %c0_16 = arith.constant 0 : index
    %c6_17 = arith.constant 6 : index
    %24 = memref.load %arg2[%c0_16, %c6_17] : memref<1x10xf32, #tpu.memory_space<smem>>
    %25 = arith.mulf %23, %24 : f32
    %26 = arith.addf %22, %25 : f32
    %c2_18 = arith.constant 2 : index
    %c0_19 = arith.constant 0 : index
    %27 = memref.load %arg1[%c2_18, %c0_19] : memref<10x1xf32, #tpu.memory_space<smem>>
    %c0_20 = arith.constant 0 : index
    %c7_21 = arith.constant 7 : index
    %28 = memref.load %arg2[%c0_20, %c7_21] : memref<1x10xf32, #tpu.memory_space<smem>>
    %29 = arith.mulf %27, %28 : f32
    %30 = arith.addf %26, %29 : f32
    %c3_22 = arith.constant 3 : index
    %c0_23 = arith.constant 0 : index
    %31 = memref.load %arg1[%c3_22, %c0_23] : memref<10x1xf32, #tpu.memory_space<smem>>
    %c0_24 = arith.constant 0 : index
    %c8_25 = arith.constant 8 : index
    %32 = memref.load %arg2[%c0_24, %c8_25] : memref<1x10xf32, #tpu.memory_space<smem>>
    %33 = arith.mulf %31, %32 : f32
    %34 = arith.addf %30, %33 : f32
    %c4_26 = arith.constant 4 : index
    %c0_27 = arith.constant 0 : index
    %35 = memref.load %arg1[%c4_26, %c0_27] : memref<10x1xf32, #tpu.memory_space<smem>>
    %c0_28 = arith.constant 0 : index
    %c9_29 = arith.constant 9 : index
    %36 = memref.load %arg2[%c0_28, %c9_29] : memref<1x10xf32, #tpu.memory_space<smem>>
    %37 = arith.mulf %35, %36 : f32
    %38 = arith.addf %34, %37 : f32
    %c0_30 = arith.constant 0 : index
    %c0_31 = arith.constant 0 : index
    %39 = vector.load %arg3[%c0_30, %c0_31] : memref<8x128xf32, #tpu.memory_space<vmem>>, vector<8x128xf32>
    %40 = vector.broadcast %38 : f32 to vector<8x128xf32>
    %41 = arith.mulf %39, %40 : vector<8x128xf32>
    %c0_32 = arith.constant 0 : index
    %c0_33 = arith.constant 0 : index
    %42 = vector.load %arg4[%c0_32, %c0_33] : memref<8x128xf32, #tpu.memory_space<vmem>>, vector<8x128xf32>
    tpu.vector_store %arg4[%c0_32, %c0_33], %41 {strides = array<i32>} : memref<8x128xf32, #tpu.memory_space<vmem>>, vector<8x128xf32>,
    return
  }
  func.func @transform_0(%arg0: i32) -> (i32, i32) {
    %c0_i32 = arith.constant 0 : i32
    %c0_i32_0 = arith.constant 0 : i32
    %c0_i32_1 = arith.constant 0 : i32
    return %c0_i32, %c0_i32_0 : i32, i32
  }
  func.func @transform_1(%arg0: i32) -> (i32, i32) {
    %c0_i32 = arith.constant 0 : i32
    %c0_i32_0 = arith.constant 0 : i32
    %c0_i32_1 = arith.constant 0 : i32
    return %c0_i32, %c0_i32_0 : i32, i32
  }
  func.func @transform_2(%arg0: i32) -> (i32, i32) {
    %c0_i32 = arith.constant 0 : i32
    %c0_i32_0 = arith.constant 0 : i32
    return %arg0, %c0_i32 : i32, i32
  }
  func.func @transform_3(%arg0: i32) -> (i32, i32) {
    %c0_i32 = arith.constant 0 : i32
    %c0_i32_0 = arith.constant 0 : i32
    return %arg0, %c0_i32 : i32, i32
  }
}

</mosaic_0001>

<bundles_post_ra>
// kernel: tpu_custom_call.1
= control target key start
LH: loop header
LB: loop body
LE: loop exit
PB: predicated region body
PF: predicated region fallthrough
CT: control target
= control target key end

     0   :  { %8 = vsyncpa [#allocation4], 0  ;;  %s211_s0 = inlined_call_operand.vmem [shape: f32[10,1], index: 0, kind: input, shape index: {}]   ;;  %s212_s1 = inlined_call_operand.vmem [shape: f32[1,10], index: 1, kind: input, shape index: {}]   ;;  %s213_s2 = inlined_call_operand.vmem [shape: f32[8,128], index: 2, kind: input, shape index: {}]   ;;  %s214_s3 = inlined_call_operand.hbm [shape: f32[8,128], index: 3, kind: output, shape index: {}]  }
   0x1   :  { %9 = vsyncpa [#allocation6], 0 }
   0x2   :  { %10 = vsyncpa [#allocation3], 0  ;;  %s16_s14 = sshll.u32 %s211_s0, 4  ;;  %s29_s17 = sshll.u32 %s212_s1, 4  ;;  %s17_s14 = int_to_ptr.vmem [resolvable:$true] %s16_s14  ;;  %s30_s17 = int_to_ptr.vmem [resolvable:$true] %s29_s17 }
   0x3   :  { %s124_s18 = scalar_lea.vmem %s17_s14, 256  ;;  %p129_p1 = scmp.lt.s32.totalorder %s17_s14, %s17_s14 }
   0x4   :  { %p125_p0 = scmp.ne.s32.totalorder %s17_s14, %s124_s18  ;;  %p130_p2 = scmp.lt.s32.totalorder %s124_s18, %s124_s18 }
   0x6   :  { %p131_p3 = por %p130_p2, %p129_p1 }
   0x8   :  { %p132_p4 = pnand %p131_p3, %p125_p0 }
   0xa   :  { %135 = shalt.err (!%p132_p4)
}
   0xb   :  { %s174_s19 = smov [#allocation2]   ;;  %s175_s20 = smov 128  }
   0xc   :  { %s176_s21 = smov 8   ;;  %s136_s22 = scalar_lea.vmem %s30_s17, 16 }
   0xd   :  { %22 = dma.vmem_to_smem %s17_s14, 256, %s174_s19, [#allocation4], %s175_s20, %s175_s20, %s176_s21  }
   0xe   :  { %p137_p5 = scmp.ne.s32.totalorder %s30_s17, %s136_s22  ;;  %p141_p6 = scmp.lt.s32.totalorder %s30_s17, %s30_s17 }
   0xf   :  { %p142_p7 = scmp.lt.s32.totalorder %s136_s22, %s136_s22 }
  0x11   :  { %p143_p8 = por %p142_p7, %p141_p6 }
  0x13   :  { %p144_p9 = pnand %p143_p8, %p137_p5 }
  0x15   :  { %147 = shalt.err (!%p144_p9)
}
  0x16   :  { %s177_s0 = smov [#allocation5]  }
  0x17   :  { %32 = dma.vmem_to_smem %s30_s17, 16, %s177_s0, [#allocation6]  }
  0x18   :  { %168 = dma.done.wait [#allocation4], 256  }
  0x19   :  { %169 = vsyncadd [#allocation4], 4294967040 }
  0x1a   :  { %170 = dma.done.wait [#allocation6], 16  }
  0x1b   :  { %171 = vsyncadd [#allocation6], 4294967280 }
  0x1c   :  { %41 = sfence }
  0x1d   :  { %s101_s1 = sld [smem:[#allocation2 + $0x300]]  ;;  %v81_v0 = vld [vmem:[%s213_s2] sm:$0xff] }
  0x1e   :  { %s43_s23 = sld [smem:[#allocation5]] }
  0x1f   :  { %s102_s24 = sld [smem:[#allocation2 + $0x380]] }
  0x20   :  { %s103_s25 = sld [smem:[#allocation5 + $0x1]] }
  0x21   :  { %s104_s26 = sld [smem:[#allocation2 + $0x400]] }
  0x22   :  { %s105_s27 = sld [smem:[#allocation5 + $0x2]] }
  0x23   :  { %s106_s28 = sld [smem:[#allocation2 + $0x480]] }
  0x24   :  { %s44_s29 = smul.f32 %s101_s1, %s43_s23  ;;  %s107_s30 = sld [smem:[#allocation5 + $0x3]] }
  0x25   :  { %s57_s4 = sld [smem:[#allocation2]] }
  0x26   :  { %s47_s5 = smul.f32 %s103_s25, %s102_s24  ;;  %s108_s6 = sld [smem:[#allocation5 + $0x4]] }
  0x27   :  { %s109_s7 = sld [smem:[#allocation2 + $0x80]] }
  0x28   :  { %s48_s8 = sadd.f32 %s47_s5, %s44_s29  ;;  %s51_s9 = smul.f32 %s105_s27, %s104_s26 }
  0x29   :  { %s110_s10 = sld [smem:[#allocation5 + $0x5]] }
  0x2a   :  { %s52_s11 = sadd.f32 %s51_s9, %s48_s8  ;;  %s55_s12 = smul.f32 %s107_s30, %s106_s28 }
  0x2b   :  { %s111_s13 = sld [smem:[#allocation2 + $0x280]] }
  0x2c   :  { %s56_s14 = sadd.f32 %s55_s12, %s52_s11  ;;  %s59_s15 = smul.f32 %s108_s6, %s57_s4 }
  0x2d   :  { %s112_s16 = sld [smem:[#allocation5 + $0x6]]  ;;  %s178_s6 = smov [#allocation7]  }
  0x2e   :  { %s60_s17 = sadd.f32 %s59_s15, %s56_s14 }
  0x2f   :  { %s63_s18 = smul.f32 %s110_s10, %s109_s7  ;;  %s113_s19 = sld [smem:[#allocation2 + $0x100]] }
  0x30   :  { %s114_s20 = sld [smem:[#allocation5 + $0x7]]  ;;  %s91_s7 = sshll.u32 %s178_s6, 4  ;;  %s92_s7 = int_to_ptr.vmem [resolvable:$true] %s91_s7 }
  0x31   :  { %s64_s21 = sadd.f32 %s63_s18, %s60_s17  ;;  %s148_s9 = scalar_lea.vmem %s92_s7, 128 }
  0x32   :  { %s115_s22 = sld [smem:[#allocation2 + $0x180]]  ;;  %p149_p10 = scmp.ne.s32.totalorder %s92_s7, %s148_s9 }
  0x33   :  { %s67_s0 = smul.f32 %s112_s16, %s111_s13  ;;  %s116_s1 = sld [smem:[#allocation5 + $0x8]] }
  0x34   :  { %s117_s23 = sld [smem:[#allocation2 + $0x200]]  ;;  %p153_p11 = scmp.lt.s32.totalorder %s92_s7, %s92_s7 }
  0x35   :  { %s68_s24 = sadd.f32 %s67_s0, %s64_s21  ;;  %p154_p12 = scmp.lt.s32.totalorder %s148_s9, %s148_s9 }
  0x36   :  { %s71_s25 = smul.f32 %s114_s20, %s113_s19  ;;  %s118_s29 = sld [smem:[#allocation5 + $0x9]] }
  0x37   :  { %p155_p13 = por %p154_p12, %p153_p11 }
  0x38   :  { %s72_s26 = sadd.f32 %s71_s25, %s68_s24 }
  0x39   :  { %s75_s27 = smul.f32 %s116_s1, %s115_s22  ;;  %p156_p0 = pnand %p155_p13, %p149_p10 }
  0x3b   :  { %s76_s5 = sadd.f32 %s75_s27, %s72_s26 }
  0x3c   :  { %s79_s28 = smul.f32 %s118_s29, %s117_s23 }
  0x3e   :  { %s80_s30 = sadd.f32 %s79_s28, %s76_s5 }
  0x40   :  { %v82_v1 = vstv %s80_s30 }
  0x41   :  { %v83_v2 = vmul.f32 %v82_v1, %v81_v0 }
  0x43   :  { %84 = vst [vmem:[#allocation7] sm:$0xff] %v83_v2 }
  0x44   :  { %159 = shalt.err (!%p156_p0)
}
  0x45   :  { %94 = dma.vmem_to_hbm [thread:$0]  %s92_s7, 128, %s214_s3, [#allocation3]  }
  0x46   :  { %172 = dma.done.wait [#allocation3], 128  }
  0x47   :  { %173 = vsyncadd [#allocation3], 4294967168 }
  0x48   :  { %98 = vsyncpa [#allocation3], 1 }
  0x49   :  { %99 = vsyncpa [#allocation4], 1 }
  0x4a   :  { %100 = vsyncpa [#allocation6], 1 }

</bundles_post_ra>
